<compile_context>
chip_gen: v5e
topology: v5e:2x2
jax: 0.10.0
libtpu: 0.0.40
codegen_flags: <defaults>
</compile_context>

<pallas_src>
import jax
import jax.numpy as jnp
from jax.experimental import pallas as pl
from jax.experimental.pallas import tpu as pltpu

_LANES = 128


def _depth_kernel(scale_ref, flow_ref, out_ref):
    """depth = scale[n] / flow_x for one lane-dense (tr, 128) tile.

    scale_ref : SMEM (N,) float32     scalar-prefetched, = -baseline (* 0.125)
    flow_ref  : VMEM (tr, 128) f32    channel-0 (horizontal) flow tile
    out_ref   : VMEM (tr, 128) f32
    """
    i = pl.program_id(0)                      # batch axis (not the row-tile axis)
    # Exact scalar/tensor divide: (-b)/f == b/(-f) and *0.125 is exact, so the
    # result is bit-identical to the reference.
    out_ref[...] = scale_ref[i] / flow_ref[...]


def _row_tile_cap():
    """Largest row tile (at 128 f32 lanes) per chip generation."""
    try:
        kind = jax.devices()[0].device_kind.lower()
    except Exception:
        kind = ""
    if ("v6" in kind) or ("v7" in kind):
        # 4 MiB tiles: 2 arrays x 2 buffers = 16 MiB, fits 32 MiB scoped VMEM.
        return 8192
    # v5e (16 MiB default scoped VMEM) / unknown: 2 MiB tiles.
    return 4096


def depth_from_flow(flow: jax.Array, baseline: jax.Array, upsample: bool = True):
    """Pallas equivalent of DepthEstimator's depth computation.

    flow     : (N, 2, H, W) float32  -- RAFT flow prediction
    baseline : (N,)         float32  -- stereo baselines
    returns  : (N, 1, H, W) float32  -- depth map
    """
    n, c, h, w = flow.shape
    assert c == 2, "flow must have 2 channels (u, v)"
    flow = flow.astype(jnp.float32)
    baseline = baseline.astype(jnp.float32)

    # Fold sign (and the /8 for upsample=False) into a per-batch scalar.
    scale = -baseline
    if not upsample:                      # static python bool
        scale = scale * jnp.float32(0.125)

    hw = h * w
    if hw % _LANES == 0:
        # Copy-free path: metadata reshape; only channel 0 is DMA'd by the
        # kernel (channel block squeezed), channel 1 never leaves HBM.
        r = hw // _LANES
        flow_in = flow.reshape(n, 2, r, _LANES)
        has_channel_dim = True
        padded = False
    else:
        # Pad flattened spatial axis up to a multiple of 128 with a nonzero
        # sentinel (1.0) so padded lanes never divide by zero; slice off
        # the padding from the output.  Requires extracting channel 0.
        hw_pad = pl.cdiv(hw, _LANES) * _LANES
        r = hw_pad // _LANES
        flow0 = flow[:, 0].reshape(n, hw)
        flow0 = jnp.pad(flow0, ((0, 0), (0, hw_pad - hw)), constant_values=1.0)
        flow_in = flow0.reshape(n, r, _LANES)
        has_channel_dim = False
        padded = True

    # ---- Row-tile selection -------------------------------------------------
    tr_max = _row_tile_cap()
    tiles_fit = pl.cdiv(r, tr_max)            # tiles needed to respect VMEM cap
    tiles_want = pl.cdiv(8, n)                # aim for >= ~8 total grid steps
    tiles = min(max(tiles_fit, tiles_want), max(1, r // 8))
    tr = pl.cdiv(r, tiles)                    # balanced tile size
    if tr < r:
        tr = min(r, ((tr + 7) // 8) * 8)      # (8,128) divisibility when tiled
    num_row_tiles = pl.cdiv(r, tr)

    # ---- Specs --------------------------------------------------------------
    if has_channel_dim:
        in_spec = pl.BlockSpec(
            (pl.Squeezed(), pl.Squeezed(), tr, _LANES),
            lambda i, j, s: (i, 0, j, 0),     # channel block index 0 -> flow u
        )
    else:
        in_spec = pl.BlockSpec(
            (pl.Squeezed(), tr, _LANES),
            lambda i, j, s: (i, j, 0),
        )
    out_spec = pl.BlockSpec(
        (pl.Squeezed(), tr, _LANES),
        lambda i, j, s: (i, j, 0),
    )

    grid_spec = pltpu.PrefetchScalarGridSpec(
        num_scalar_prefetch=1,                # scale -> SMEM
        grid=(n, num_row_tiles),
        in_specs=[in_spec],
        out_specs=out_spec,
    )

    out = pl.pallas_call(
        _depth_kernel,
        out_shape=jax.ShapeDtypeStruct((n, r, _LANES), jnp.float32),
        grid_spec=grid_spec,
        compiler_params=pltpu.CompilerParams(
            dimension_semantics=("parallel", "parallel"),
            vmem_limit_bytes=32 * 1024 * 1024,
        ),
    )(scale, flow_in)

    if padded:
        out = out.reshape(n, r * _LANES)[:, :hw]
    return out.reshape(n, 1, h, w)


def _reference(flow, baseline, upsample=True):
    depth = baseline[:, None, None] / (-flow[:, 0])
    if not upsample:
        depth = depth / 8.0
    return depth[:, None, :, :]


if __name__ == "__main__":
    key = jax.random.PRNGKey(0)
    k_img, k_flow, k_base = jax.random.split(key, 3)

    # Small shapes consistent with the module: N=2, C=3 stereo images, 16x16.
    N, H, W = 2, 16, 16
    imagel = jax.random.normal(k_img, (N, 3, H, W), dtype=jnp.float32)
    imager = jax.random.normal(k_img, (N, 3, H, W), dtype=jnp.float32)
    del imagel, imager  # consumed only by the (not reimplemented) RAFT backbone

    # Synthetic stand-in for RAFT's flow output: horizontal flow kept strictly
    # negative (left->right stereo disparity) so the division is well defined.
    flow_u = -(jax.random.uniform(k_flow, (N, 1, H, W), dtype=jnp.float32) + 0.5)
    flow_v = jax.random.normal(k_flow, (N, 1, H, W), dtype=jnp.float32) * 0.1
    flow = jnp.concatenate([flow_u, flow_v], axis=1)           # (N, 2, H, W)

    baseline = jax.random.uniform(
        k_base, (N,), dtype=jnp.float32, minval=0.1, maxval=0.6
    )

    # upsample=True path (lane-dense copy-free path, H*W % 128 == 0)
    depth = jax.block_until_ready(depth_from_flow(flow, baseline, upsample=True))
    ref = _reference(flow, baseline, upsample=True)
    assert depth.shape == (N, 1, H, W)
    assert jnp.allclose(depth, ref, rtol=1e-5, atol=1e-5)

    # upsample=False path (extra /8 folded into the prefetched scalar)
    depth_lo = jax.block_until_ready(depth_from_flow(flow, baseline, upsample=False))
    ref_lo = _reference(flow, baseline, upsample=False)
    assert jnp.allclose(depth_lo, ref_lo, rtol=1e-5, atol=1e-5)

    # Non-128-multiple spatial size -> exercises the pad-to-lane-dense path.
    Hn, Wn = 16, 12
    flow_u2 = -(jax.random.uniform(k_flow, (N, 1, Hn, Wn), dtype=jnp.float32) + 0.5)
    flow_v2 = jax.random.normal(k_flow, (N, 1, Hn, Wn), dtype=jnp.float32) * 0.1
    flow2 = jnp.concatenate([flow_u2, flow_v2], axis=1)        # (N, 2, 16, 12)
    depth2 = jax.block_until_ready(depth_from_flow(flow2, baseline, upsample=True))
    ref2 = _reference(flow2, baseline, upsample=True)
    assert depth2.shape == (N, 1, Hn, Wn)
    assert jnp.allclose(depth2, ref2, rtol=1e-5, atol=1e-5)

    print("KERNEL_OK")
</pallas_src>

<mosaic_0001>
module attributes {stable_mosaic.version = 11 : i64} {
  func.func @_depth_kernel(%arg0: i32, %arg1: i32, %arg2: memref<2xf32, #tpu.memory_space<smem>>, %arg3: memref<1x1x2x128xf32, #tpu.memory_space<vmem>>, %arg4: memref<1x2x128xf32, #tpu.memory_space<vmem>>) attributes {dimension_semantics = [#tpu.dimension_semantics<parallel>, #tpu.dimension_semantics<parallel>], iteration_bounds = array<i64: 2, 1>, scalar_prefetch = 1 : i64, scratch_operands = 0 : i64, tpu.core_type = #tpu.core_type<tc>, window_params = [{transform_indices = @transform_0, window_bounds = array<i64: 1, 1, 2, 128>}, {transform_indices = @transform_1, window_bounds = array<i64: 1, 2, 128>}]} {
    %0 = arith.index_cast %arg0 : i32 to index
    %1 = memref.load %arg2[%0] : memref<2xf32, #tpu.memory_space<smem>>
    %c0 = arith.constant 0 : index
    %c0_0 = arith.constant 0 : index
    %c0_1 = arith.constant 0 : index
    %c0_2 = arith.constant 0 : index
    %2 = vector.load %arg3[%c0, %c0_0, %c0_1, %c0_2] : memref<1x1x2x128xf32, #tpu.memory_space<vmem>>, vector<1x1x2x128xf32>
    %3 = vector.shape_cast %2 : vector<1x1x2x128xf32> to vector<2x128xf32>
    %4 = vector.broadcast %1 : f32 to vector<2x128xf32>
    %5 = arith.divf %4, %3 : vector<2x128xf32>
    %c0_3 = arith.constant 0 : index
    %c0_4 = arith.constant 0 : index
    %c0_5 = arith.constant 0 : index
    %6 = vector.load %arg4[%c0_3, %c0_4, %c0_5] : memref<1x2x128xf32, #tpu.memory_space<vmem>>, vector<1x2x128xf32>
    %7 = vector.shape_cast %6 : vector<1x2x128xf32> to vector<2x128xf32>
    %8 = vector.shape_cast %5 : vector<2x128xf32> to vector<1x2x128xf32>
    tpu.vector_store %arg4[%c0_3, %c0_4, %c0_5], %8 {strides = array<i32>} : memref<1x2x128xf32, #tpu.memory_space<vmem>>, vector<1x2x128xf32>,
    return
  }
  func.func @transform_0(%arg0: i32, %arg1: i32, %arg2: memref<2xf32, #tpu.memory_space<smem>>) -> (i32, i32, i32, i32) {
    %c0_i32 = arith.constant 0 : i32
    %c0_i32_0 = arith.constant 0 : i32
    %c0_i32_1 = arith.constant 0 : i32
    return %arg0, %c0_i32, %arg1, %c0_i32_0 : i32, i32, i32, i32
  }
  func.func @transform_1(%arg0: i32, %arg1: i32, %arg2: memref<2xf32, #tpu.memory_space<smem>>) -> (i32, i32, i32) {
    %c0_i32 = arith.constant 0 : i32
    %c0_i32_0 = arith.constant 0 : i32
    return %arg0, %arg1, %c0_i32 : i32, i32, i32
  }
}

</mosaic_0001>

<bundles_post_ra>
// kernel: tpu_custom_call.1
= control target key start
LH: loop header
LB: loop body
LE: loop exit
PB: predicated region body
PF: predicated region fallthrough
CT: control target
= control target key end

     0   :  { %s486_s12 = smov [#allocation3]   ;;  %s626_s0 = inlined_call_operand.hbm [shape: f32[2], index: 0, kind: input, shape index: {}]   ;;  %s627_s1 = inlined_call_operand.hbm [shape: f32[2,2,2,128], index: 1, kind: input, shape index: {}]   ;;  %s628_s2 = inlined_call_operand.hbm [shape: f32[2,2,128], index: 2, kind: output, shape index: {}]  }
   0x1   :  { %s8_s11 = sshll.u32 %s626_s0, 4  ;;  %s9_s11 = int_to_ptr.hbm [resolvable:$true] %s8_s11 }
   0x2   :  { %11 = dma.hbm_to_smem %s9_s11, 16, %s486_s12, [#allocation2] }
   0x3   :  { %452 = dma.done.wait [#allocation2], 16 }
   0x4   :  { %453 = vsyncadd [#allocation2], 4294967280 }
   0x5   :  { %14 = sfence }
   0x6   :  { %15 = vsyncpa [#allocation5], 0 }
   0x7   :  { %17 = vsyncpa [#allocation5 + $0x1], 0 }
   0x8   :  { %18 = vsyncpa [#allocation6], 0 }
   0x9   :  { %20 = vsyncpa [#allocation6 + $0x1], 0  ;;  %s505_s13 = smov 0   ;;  %s507_s14 = smov 0  }
   0xa   :  { %s509_s15 = smov 0   ;;  %s511_s16 = smov 0  }
   0xb   :  { %s513_s17 = smov 0   ;;  %s515_s0 = smov 0  }
   0xc LB: > { %s278_s18 = sadd.s32 4294967295, %s484_s0   ;;  %s279_s19 = sadd.s32 4294967294, %s484_s0   ;;  %s484_s0 = sphi %s515_s0, %s26_s0   ;;  %s480_s17 = sphi %s513_s17, %s637_s17   ;;  %s476_s16 = sphi %s511_s16, %s636_s16   ;;  %s472_s15 = sphi %s509_s15, %s635_s15   ;;  %s468_s14 = sphi %s507_s14, %s634_s14   ;;  %s464_s13 = sphi %s505_s13, %s633_s13  }
   0xd   : > { %s38_s20 = sadd.s32 1, %s480_s17  ;;  %s47_s21 = sadd.s32 1, %s472_s15 }
   0xe   : > { %p40_p0 = scmp.ge.s32.totalorder %s38_s20, 2  ;;  %p54_p1 = scmp.ne.s32.totalorder %s472_s15, %s468_s14 }
   0xf   : > { %p55_p2 = scmp.eq.s32.totalorder %s484_s0, 0  ;;  %p60_p3 = scmp.ne.s32.totalorder %s468_s14, %s464_s13 }
  0x10   : > { %s639_s20 = smov (%p40_p0, %s38_s20), 0  ;;  %p61_p5 = scmp.eq.s32.totalorder %s278_s18, 0 }
  0x11   : > { %p546_p4 = por %p55_p2, %p54_p1  ;;  %s42_s23 = ssub.s32 %s480_s17, %s639_s20 }
  0x12   : > { %p86_p6 = scmp.eq.s32.totalorder %s278_s18, 1  ;;  %p45_p7 = scmp.eq.s32.totalorder %s42_s23, 0 }
  0x13   : > { %p552_p8 = por %p61_p5, %p60_p3  ;;  %p92_p10 = scmp.eq.s32.totalorder %s279_s19, 1 }
  0x14   : > { %p556_p9 = por %p86_p6, %p54_p1  ;;  %p281_p12 = scmp.ge.s32.totalorder %s484_s0, 2 }
  0x15   : > { %s561_s26 = scalar_select %p45_p7, %s472_s15, %s47_s21  }
  0x16   : > { %p563_p11 = por %p92_p10, %p60_p3  ;;  %p305_p13 = scmp.lt.s32.totalorder %s484_s0, 2 }
  0x17   : > { %s112_s28 = sand.u32 1, %s472_s15   ;;  %s292_s30 = sshll.u32 %s480_s17, 2 }
  0x18   : > { %s282_s29 = sshll.u32 %s112_s28, 1  ;;  %s122_s5 = scalar_lea.hbm %s627_s1, %s292_s30 }
  0x19   : > { %s116_s6 = scalar_lea.vmem [#allocation4], %s282_s29  ;;  %s124_s8 = sshll.u32 %s122_s5, 4  ;;  %s125_s8 = int_to_ptr.hbm [resolvable:$true] %s124_s8 }
  0x1a   : > { %s126_s7 = sshll.u32 %s116_s6, 4  ;;  %p298_p0 = pnand %p305_p13, %p546_p4  ;;  %s127_s7 = int_to_ptr.vmem [resolvable:$true] %s126_s7 }
  0x1b   : > { %p285_p1 = scmp.ge.s32.totalorder %s484_s0, 1  ;;  %p131_p2 = scmp.lt.s32.totalorder %s484_s0, 3 }
  0x1c   : > { %s113_s9 = scalar_lea.sflag [#allocation5], %s112_s28 }
  0x1d   : > { %300 = dma.hbm_to_vmem [thread:$0]  (!%p298_p0), %s125_s8, 32, %s127_s7, %s113_s9  }
  0x1e   : > { %p132_p3 = pnand %p285_p1, %p131_p2 }
  0x1f   : > { %s579_s10 = sand.u32 (!%p132_p3), 1, %s468_s14  }
  0x20   : > { %135 = sbr.rel (%p132_p3) target bundleno = 61 (0x3d), region = 24  ;;  %s286_s11 = sshll.u32 (!%p132_p3), %s579_s10, 1 }
  0x21   : > { %s138_s12 = scalar_lea.sflag (!%p132_p3), [#allocation5], %s579_s10  ;;  %s141_s18 = scalar_lea.vmem (!%p132_p3), [#allocation4], %s286_s11 }
  0x25   : > { %455 = dma.done.wait (%p552_p8), %s138_s12, 32  }
  0x26   : > { %457 = vsyncadd (%p552_p8), %s138_s12, 4294967264  ;;  %v162_v0 = vld [vmem:[%s141_s18] sm:$0x3]  ;;  %s161_s19 = sld [smem:[#allocation3 + %s476_s16]]  ;;  %s289_s21 = sshll.u32 %s476_s16, 1 }
  0x27   : > { %356 = vrcp.f32 %v162_v0  ;;  %v175_v3 = vand.u32 2147483648, %v162_v0  ;;  %vm169_vm0 = vweird.f32 %v162_v0  ;;  %v173_v5 = vand.u32 2147483647, %v162_v0  ;;  %s192_s24 = scalar_lea.hbm %s628_s2, %s289_s21  ;;  %s160_s28 = scalar_lea.vmem [#allocation7], %s286_s11 }
  0x28   : > { %s194_s29 = sshll.u32 %s160_s28, 4  ;;  %s196_s30 = sshll.u32 %s192_s24, 4  ;;  %s195_s29 = int_to_ptr.vmem [resolvable:$true] %s194_s29  ;;  %s197_s30 = int_to_ptr.hbm [resolvable:$true] %s196_s30 }
  0x29   : > { %v176_v7 = vor.u32 1.1754944e-38, %v175_v3  ;;  %vm174_vm3 = vcmp.eq.f32.partialorder %v173_v5, 8.507059e+37  ;;  %s181_s16 = scalar_lea.sflag [#allocation6], %s579_s10  ;;  %s414_s3 = sshra.s32 %s197_s30, 4  ;;  %s415_s3 = int_to_ptr.hbm [resolvable:$true] %s414_s3 }
  0x2a   : > { %s416_s4 = scalar_lea.hbm %s415_s3, 2  ;;  %s420_s7 = scalar_lea.hbm %s628_s2, 4 }
  0x2b   : > { %p417_p4 = scmp.ne.s32.totalorder %s415_s3, %s416_s4  ;;  %p421_p7 = scmp.lt.s32.totalorder %s415_s3, %s628_s2 }
  0x2c   : > { %v163_v9 = vstv %s161_s19  ;;  %p422_p8 = scmp.lt.s32.totalorder %s420_s7, %s416_s4 }
  0x2d   : > { %v357_v1 = vpop.eup %356  ;;  %p418_p5 = pnand %p417_p4, %p556_p9 }
  0x2e   : > { %v165_v2 = vmul.f32 %v357_v1, %v162_v0  ;;  %vm170_vm1 = vweird.f32 %v357_v1  ;;  %p423_p10 = por %p422_p8, %p421_p7 }
  0x2f   : > { %vm171_vm2 = vmor %vm169_vm0, %vm170_vm1  ;;  %p419_p6 = pneg %p418_p5 }
  0x30   : > { %v166_v4 = vsub.f32 1.0, %v165_v2 }
  0x31   : > { %p424_p13 = pnand %p423_p10, %p419_p6 }
  0x32   : > { %v167_v6 = vmul.f32 %v357_v1, %v166_v4 }
  0x34   : > { %v168_v8 = vadd.f32 %v357_v1, %v167_v6 }
  0x36   : > { %v172_v10 = vsel %vm171_vm2, %v357_v1, %v168_v8 }
  0x37   : > { %v177_v11 = vsel %vm174_vm3, %v176_v7, %v172_v10 }
  0x38   : > { %v178_v12 = vmul.f32 %v177_v11, %v163_v9 }
  0x3a   : > { %179 = vst [vmem:[%s160_s28] sm:$0x3] %v178_v12 }
  0x3b   : > { %427 = shalt.err (!%p424_p13)
}
  0x3c   : > { %295 = dma.vmem_to_hbm [thread:$0]  (%p556_p9), %s195_s29, 32, %s197_s30, %s181_s16  }
  0x3d PF: > { %s208_s10 = sand.u32 1, %s464_s13   ;;  %p302_p0 = pnand %p281_p12, %p563_p11 }
  0x3e   : > { %s209_s11 = scalar_lea.sflag [#allocation6], %s208_s10 }
  0x3f   : > { %p303_p1 = pneg %p302_p0 }
  0x41   : > { %459 = dma.done.wait (%p303_p1), %s209_s11, 32  }
  0x42   : > { %461 = vsyncadd (%p303_p1), %s209_s11, 4294967264  ;;  %s26_s0 = sadd.s32 1, %s484_s0   ;;  %s633_s13 = smov %s468_s14 }
  0x43   : > { %p23_p2 = scmp.ge.s32.totalorder %s26_s0, 4   ;;  %s634_s14 = smov %s472_s15 }
  0x44   : > { %s635_s15 = smov %s561_s26  ;;  %s636_s16 = smov %s480_s17 }
  0x45   : > { %s637_s17 = smov %s639_s20  ;;  %25 = sbr.rel (!%p23_p2) target bundleno = 12 (0xc), region = 69 }
  0x4a   :  { %215 = vsyncpa [#allocation5], 1 }
  0x4b   :  { %217 = vsyncpa [#allocation5 + $0x1], 1 }
  0x4c   :  { %218 = vsyncpa [#allocation6], 1 }
  0x4d   :  { %220 = vsyncpa [#allocation6 + $0x1], 1 }

</bundles_post_ra>
